<compile_context>
chip_gen: v6e
topology: v6e:2x2x1
jax: 0.10.0
libtpu: 0.0.40
codegen_flags: <defaults>
</compile_context>

<pallas_src>
import jax
import jax.numpy as jnp
from jax.experimental import pallas as pl
from jax.experimental.pallas import tpu as pltpu


def _residual_conv1x1_kernel(x_ref, w_ref, b_ref, o_ref):
    # x_ref: (C, t_hw)   one image's pixel slab; channels on sublanes,
    #                    spatial positions on lanes (lane-dense stores).
    # w_ref: (C_out, C_in)  pointwise-conv weight.
    # b_ref: (C_out, 1)     bias (always f32).
    # o_ref: (C, t_hw)
    x = x_ref[...]
    # Pointwise conv == per-pixel channel matmul: y[o, p] = sum_c w[o, c] x[c, p]
    y = jnp.dot(w_ref[...], x, preferred_element_type=jnp.float32)
    y = y + b_ref[...]                    # bias broadcast over lanes, in f32
    y = y + x.astype(jnp.float32)         # residual add in f32
    o_ref[...] = y.astype(o_ref.dtype)


def _round_up(x, m):
    return (x + m - 1) // m * m


def _pick_lane_tile(hw, c, itemsize):
    # Target ~2 MiB per x tile (amortizes per-grid-step pipeline overhead),
    # capped at the 128-aligned full spatial extent.
    target_elems = (2 << 20) // max(1, c * itemsize)
    t = max(128, (target_elems // 128) * 128)
    return min(t, _round_up(hw, 128))


def residual_conv1x1(x_nchw, weight, bias, *, t_hw=None, compute_dtype=None):
    """out = Conv2d(C, C, kernel_size=1)(x) + x, PyTorch NCHW semantics.

    x_nchw : (B, C, H, W)
    weight : (C_out, C_in, 1, 1)   (PyTorch conv weight layout)
    bias   : (C_out,)
    compute_dtype : optional HBM dtype for x/w/out (e.g. jnp.bfloat16).
                    Accumulate + bias + residual adds stay in f32.
    """
    B, C, H, W = x_nchw.shape
    HW = H * W
    cdt = jnp.dtype(compute_dtype) if compute_dtype is not None else jnp.dtype(x_nchw.dtype)
    itemsize = cdt.itemsize

    if t_hw is None:
        t_hw = _pick_lane_tile(HW, C, itemsize)
    t_hw = max(128, _round_up(t_hw, 128))
    hw_pad = _round_up(HW, t_hw)

    # Native layout: free reshapes only, no transposes.
    x3 = x_nchw.reshape(B, C, HW)
    if hw_pad != HW:
        x3 = jnp.pad(x3, ((0, 0), (0, 0), (0, hw_pad - HW)))
    x3 = x3.astype(cdt)

    w2 = weight.reshape(C, C).astype(cdt)         # (C_out, C_in): y = w @ x
    b2 = bias.reshape(C, 1).astype(jnp.float32)   # bias / adds kept in f32

    # VMEM budget: double-buffered x + out tiles, plus weight/bias + margin.
    tile_bytes = C * t_hw * itemsize
    vmem_limit = int(min(max(8 * tile_bytes + (8 << 20), 32 << 20), 64 << 20))

    grid = (B, hw_pad // t_hw)
    out3 = pl.pallas_call(
        _residual_conv1x1_kernel,
        out_shape=jax.ShapeDtypeStruct((B, C, hw_pad), cdt),
        grid_spec=pltpu.PrefetchScalarGridSpec(
            num_scalar_prefetch=0,
            grid=grid,
            in_specs=[
                # x tile: batch dim squeezed, C on sublanes, HW on lanes.
                pl.BlockSpec((None, C, t_hw), lambda b, i: (b, 0, i)),
                # Weight / bias: full blocks, constant index (re-fetched once
                # by the pipeline).  Single-buffering them (pl.Buffered(1))
                # only matters for very large C on v7x's 64 MiB VMEM.
                pl.BlockSpec((C, C), lambda b, i: (0, 0)),
                pl.BlockSpec((C, 1), lambda b, i: (0, 0)),
            ],
            out_specs=pl.BlockSpec((None, C, t_hw), lambda b, i: (b, 0, i)),
        ),
        compiler_params=pltpu.CompilerParams(
            # Both axes independent -> megacore sharding on v7x.
            dimension_semantics=("parallel", "parallel"),
            vmem_limit_bytes=vmem_limit,
        ),
    )(x3, w2, b2)

    if hw_pad != HW:
        out3 = out3[:, :, :HW]
    return out3.reshape(B, C, H, W)


def _reference(x, weight, bias):
    C = weight.shape[0]
    return (jnp.einsum("oc,bchw->bohw", weight.reshape(C, C), x)
            + bias.reshape(1, C, 1, 1) + x)


if __name__ == "__main__":
    key = jax.random.PRNGKey(0)
    kx, kw, kb, kx2 = jax.random.split(key, 4)

    # ---- case 1: small unet-ish shape, f32 ----------------------------------
    B, C, H, W = 2, 8, 16, 16
    x = jax.random.normal(kx, (B, C, H, W), dtype=jnp.float32)
    weight = jax.random.normal(kw, (C, C, 1, 1), dtype=jnp.float32) * 0.1
    bias = jax.random.normal(kb, (C,), dtype=jnp.float32) * 0.1

    out = jax.block_until_ready(residual_conv1x1(x, weight, bias))
    ref = _reference(x, weight, bias)
    assert out.shape == x.shape and out.dtype == x.dtype
    assert jnp.allclose(out, ref, atol=1e-4, rtol=1e-4)

    # ---- case 2: spatial size not a multiple of 128 (remainder path) --------
    B2, C2, H2, W2 = 2, 16, 10, 10
    x2 = jax.random.normal(kx2, (B2, C2, H2, W2), dtype=jnp.float32)
    w2 = jax.random.normal(kw, (C2, C2, 1, 1), dtype=jnp.float32) * 0.1
    b2 = jax.random.normal(kb, (C2,), dtype=jnp.float32) * 0.1
    out2 = jax.block_until_ready(residual_conv1x1(x2, w2, b2))
    assert jnp.allclose(out2, _reference(x2, w2, b2), atol=1e-4, rtol=1e-4)

    # ---- case 3: bf16 HBM path (halved traffic), f32 accumulate + adds ------
    out_bf16 = jax.block_until_ready(
        residual_conv1x1(x, weight, bias, compute_dtype=jnp.bfloat16))
    assert out_bf16.dtype == jnp.bfloat16
    assert jnp.allclose(out_bf16.astype(jnp.float32), ref, atol=5e-2, rtol=5e-2)

    print("KERNEL_OK")
</pallas_src>

<mosaic_0001>
module attributes {stable_mosaic.version = 11 : i64} {
  func.func @_residual_conv1x1_kernel(%arg0: i32, %arg1: i32, %arg2: memref<1x8x256xf32, #tpu.memory_space<vmem>>, %arg3: memref<8x8xf32, #tpu.memory_space<vmem>>, %arg4: memref<8x1xf32, #tpu.memory_space<vmem>>, %arg5: memref<1x8x256xf32, #tpu.memory_space<vmem>>) attributes {dimension_semantics = [#tpu.dimension_semantics<parallel>, #tpu.dimension_semantics<parallel>], iteration_bounds = array<i64: 2, 1>, scalar_prefetch = 0 : i64, scratch_operands = 0 : i64, tpu.core_type = #tpu.core_type<tc>, window_params = [{transform_indices = @transform_0, window_bounds = array<i64: 1, 8, 256>}, {pipeline_mode = #tpu.pipeline_mode<synchronous>, transform_indices = @transform_1, window_bounds = array<i64: 8, 8>}, {pipeline_mode = #tpu.pipeline_mode<synchronous>, transform_indices = @transform_2, window_bounds = array<i64: 8, 1>}, {transform_indices = @transform_3, window_bounds = array<i64: 1, 8, 256>}]} {
    %c0 = arith.constant 0 : index
    %c0_0 = arith.constant 0 : index
    %c0_1 = arith.constant 0 : index
    %0 = vector.load %arg2[%c0, %c0_0, %c0_1] : memref<1x8x256xf32, #tpu.memory_space<vmem>>, vector<1x8x256xf32>
    %1 = vector.shape_cast %0 : vector<1x8x256xf32> to vector<8x256xf32>
    %c0_2 = arith.constant 0 : index
    %c0_3 = arith.constant 0 : index
    %2 = vector.load %arg3[%c0_2, %c0_3] : memref<8x8xf32, #tpu.memory_space<vmem>>, vector<8x8xf32>
    %cst = arith.constant dense<0.000000e+00> : vector<8x256xf32>
    %3 = tpu.matmul %2, %1, %cst {dimension_numbers = #tpu.dot_dimension_numbers<[1], [0], [0], [1], [0, 0, 1, 1], [], []>} : vector<8x8xf32>, vector<8x256xf32>, vector<8x256xf32> -> vector<8x256xf32>
    %c0_4 = arith.constant 0 : index
    %c0_5 = arith.constant 0 : index
    %4 = vector.load %arg4[%c0_4, %c0_5] : memref<8x1xf32, #tpu.memory_space<vmem>>, vector<8x1xf32>
    %5 = vector.broadcast %4 : vector<8x1xf32> to vector<8x256xf32>
    %6 = arith.addf %3, %5 : vector<8x256xf32>
    %7 = arith.addf %6, %1 : vector<8x256xf32>
    %c0_6 = arith.constant 0 : index
    %c0_7 = arith.constant 0 : index
    %c0_8 = arith.constant 0 : index
    %8 = vector.load %arg5[%c0_6, %c0_7, %c0_8] : memref<1x8x256xf32, #tpu.memory_space<vmem>>, vector<1x8x256xf32>
    %9 = vector.shape_cast %8 : vector<1x8x256xf32> to vector<8x256xf32>
    %10 = vector.shape_cast %7 : vector<8x256xf32> to vector<1x8x256xf32>
    tpu.vector_store %arg5[%c0_6, %c0_7, %c0_8], %10 {strides = array<i32>} : memref<1x8x256xf32, #tpu.memory_space<vmem>>, vector<1x8x256xf32>,
    return
  }
  func.func @transform_0(%arg0: i32, %arg1: i32) -> (i32, i32, i32) {
    %c0_i32 = arith.constant 0 : i32
    %c0_i32_0 = arith.constant 0 : i32
    return %arg0, %c0_i32, %arg1 : i32, i32, i32
  }
  func.func @transform_1(%arg0: i32, %arg1: i32) -> (i32, i32) {
    %c0_i32 = arith.constant 0 : i32
    %c0_i32_0 = arith.constant 0 : i32
    %c0_i32_1 = arith.constant 0 : i32
    return %c0_i32, %c0_i32_0 : i32, i32
  }
  func.func @transform_2(%arg0: i32, %arg1: i32) -> (i32, i32) {
    %c0_i32 = arith.constant 0 : i32
    %c0_i32_0 = arith.constant 0 : i32
    %c0_i32_1 = arith.constant 0 : i32
    return %c0_i32, %c0_i32_0 : i32, i32
  }
  func.func @transform_3(%arg0: i32, %arg1: i32) -> (i32, i32, i32) {
    %c0_i32 = arith.constant 0 : i32
    %c0_i32_0 = arith.constant 0 : i32
    return %arg0, %c0_i32, %arg1 : i32, i32, i32
  }
}

</mosaic_0001>

<bundles_post_ra>
// kernel: tpu_custom_call.1
= control target key start
LH: loop header
LB: loop body
LE: loop exit
PB: predicated region body
PF: predicated region fallthrough
CT: control target
= control target key end

     0   :  { %8 = vsyncpa [#allocation3], 0  ;;  %s753_s0 = inlined_call_operand.hbm [shape: f32[2,8,256], index: 0, kind: input, shape index: {}]   ;;  %s754_s1 = inlined_call_operand.vmem [shape: f32[8,8], index: 1, kind: input, shape index: {}]   ;;  %s755_s2 = inlined_call_operand.vmem [shape: f32[8,1], index: 2, kind: input, shape index: {}]   ;;  %s756_s3 = inlined_call_operand.hbm [shape: f32[2,8,256], index: 3, kind: output, shape index: {}]  }
   0x1   :  { %10 = vsyncpa [#allocation3 + $0x1], 0 }
   0x2   :  { %11 = vsyncpa [#allocation4], 0 }
   0x3   :  { %13 = vsyncpa [#allocation4 + $0x1], 0  ;;  %s613_s12 = smov 0   ;;  %s615_s13 = smov 0  }
   0x4   :  { %s617_s14 = smov 0   ;;  %s619_s15 = smov 0  }
   0x5   :  { %s621_s16 = smov 0   ;;  %s623_s17 = smov 0  }
   0x6 LB: > { %s396_s18 = sadd.s32 4294967295, %s587_s17   ;;  %s397_s19 = sadd.s32 4294967294, %s587_s17   ;;  %s587_s17 = sphi %s623_s17, %s19_s17   ;;  %s583_s16 = sphi %s621_s16, %s768_s16   ;;  %s579_s15 = sphi %s619_s15, %s767_s15   ;;  %s575_s14 = sphi %s617_s14, %s766_s14   ;;  %s571_s13 = sphi %s615_s13, %s765_s13   ;;  %s567_s12 = sphi %s613_s12, %s764_s12  }
   0x7   : > { %s31_s20 = sadd.s32 1, %s583_s16  ;;  %s40_s21 = sadd.s32 1, %s575_s14 }
   0x8   : > { %p33_p0 = scmp.ge.s32.totalorder %s31_s20, 2  ;;  %p47_p1 = scmp.ne.s32.totalorder %s575_s14, %s571_s13 }
   0x9   : > { %p48_p2 = scmp.eq.s32.totalorder %s587_s17, 0  ;;  %p53_p3 = scmp.ne.s32.totalorder %s571_s13, %s567_s12 }
   0xa   : > { %s770_s20 = smov (%p33_p0, %s31_s20), 0  ;;  %p54_p5 = scmp.eq.s32.totalorder %s396_s18, 0 }
   0xb   : > { %p654_p4 = por %p48_p2, %p47_p1  ;;  %s35_s23 = ssub.s32 %s583_s16, %s770_s20 }
   0xc   : > { %p121_p6 = scmp.eq.s32.totalorder %s396_s18, 1  ;;  %p38_p7 = scmp.eq.s32.totalorder %s35_s23, 0 }
   0xd   : > { %p660_p8 = por %p54_p5, %p53_p3  ;;  %p127_p10 = scmp.eq.s32.totalorder %s397_s19, 1 }
   0xe   : > { %p664_p9 = por %p121_p6, %p47_p1  ;;  %p426_p13 = scmp.lt.s32.totalorder %s587_s17, 2 }
   0xf   : > { %s669_s26 = scalar_select %p38_p7, %s575_s14, %s40_s21  }
  0x10   : > { %p671_p11 = por %p127_p10, %p53_p3  ;;  %s153_s28 = sand.u32 1, %s575_s14  }
  0x11   : > { %s400_s29 = sshll.u32 %s153_s28, 4  ;;  %s412_s30 = sshll.u32 %s583_s16, 8 }
  0x12   : > { %s760_s27 = scalar_select %p671_p11, 1, 0 }
  0x13   : > { %s165_s6 = scalar_lea.hbm %s753_s0, %s412_s30  ;;  %s157_s7 = scalar_lea.vmem [#allocation2], %s400_s29 }
  0x14   : > { %s167_s8 = sshll.u32 %s157_s7, 4  ;;  %p684_p0 = pnand %p426_p13, %p654_p4  ;;  %s168_s8 = int_to_ptr.vmem [resolvable:$true] %s167_s8 }
  0x15   : > { %p403_p1 = scmp.ge.s32.totalorder %s587_s17, 1  ;;  %p172_p2 = scmp.lt.s32.totalorder %s587_s17, 3 }
  0x16   : > { %s154_s10 = scalar_lea.sflag [#allocation3], %s153_s28  ;;  %p481_p3 = pneg %p684_p0 }
  0x17   : > { %s492_s11 = scalar_lea.vmem %s168_s8, 256  ;;  %s589_s18 = smov [#allocation2]  }
  0x18   : > { %p493_p5 = scmp.ne.s32.totalorder %s168_s8, %s492_s11  ;;  %s497_s19 = sshll.u32 %s589_s18, 4  ;;  %s498_s19 = int_to_ptr.vmem [resolvable:$false] %s497_s19 }
  0x19   : > { %s499_s21 = scalar_lea.vmem %s498_s19, 512  ;;  %p500_p10 = scmp.lt.s32.totalorder %s168_s8, %s498_s19 }
  0x1a   : > { %p495_p6 = pnand %p493_p5, %p481_p3  ;;  %p501_p12 = scmp.lt.s32.totalorder %s499_s21, %s492_s11 }
  0x1c   : > { %p496_p7 = pneg %p495_p6  ;;  %p502_p4 = por %p501_p12, %p500_p10 }
  0x1e   : > { %p503_p13 = pnand %p502_p4, %p496_p7 }
  0x20   : > { %506 = shalt.err (!%p503_p13)
}
  0x21   : > { %421 = dma.hbm_to_vmem [thread:$0]  (!%p684_p0), %s165_s6, 256, %s168_s8, %s154_s10  }
  0x22   : > { %p173_p11 = pnand %p403_p1, %p172_p2 }
  0x23   : > { %s699_s22 = sand.u32 (!%p173_p11), 1, %s571_s13  }
  0x24   : > { %176 = sbr.rel (%p173_p11) target bundleno = 258 (0x102), region = 32  ;;  %s404_s23 = sshll.u32 (!%p173_p11), %s699_s22, 4 }
  0x25   : > { %s179_s28 = scalar_lea.sflag (!%p173_p11), [#allocation3], %s699_s22  ;;  %s182_s29 = scalar_lea.vmem (!%p173_p11), [#allocation2], %s404_s23 }
  0x29   : > { %558 = dma.done.wait (%p660_p8), %s179_s28, 256  }
  0x2a   : > { %560 = vsyncadd (%p660_p8), %s179_s28, 4294967040  ;;  %v590_v0 = vmov 0.0   ;;  %v591_v1 = vmov 0   ;;  %v208_v2 = vld [vmem:[%s182_s29 + $0x8] sm:$0xff]  ;;  %v207_v3 = vld [vmem:[%s182_s29] sm:$0xff]  ;;  %vm216_vm0 = vcmask 64512  }
  0x2b   : > { %284 = vmatprep.mubr.f32.mxu0 %v590_v0  ;;  %478 = vset.pattern.permute.xlu0 %v591_v1  ;;  %v209_v4 = vld [vmem:[%s754_s1] sm:$0xff]  ;;  %s413_s24 = sshll.u32 %s579_s15, 8  ;;  %s204_s7 = scalar_lea.vmem [#allocation5], %s404_s23 }
  0x2c   : > { %250 = vmatprep.subr.mxu0 %v208_v2  ;;  %v210_v5 = vld [vmem:[%s755_s2] sm:$0xff]  ;;  %s312_s8 = sshll.u32 %s204_s7, 4  ;;  %s310_s11 = scalar_lea.hbm %s756_s3, %s413_s24  ;;  %s313_s8 = int_to_ptr.vmem [resolvable:$true] %s312_s8 }
  0x2d   : > { %251 = vmatpush1.msra.mxu0 %v207_v3  ;;  %213 = vperm.xlu0 %478, %v210_v5   ;;  %s296_s18 = scalar_lea.sflag [#allocation4], %s699_s22  ;;  %s507_s19 = scalar_lea.vmem %s313_s8, 256 }
  0x2e   : > { %406 = vmatmul.mubr.msk.f32.vlgmr.msra.gmra.mxu0 %vm216_vm0, %v209_v4  ;;  %p508_p8 = scmp.ne.s32.totalorder %s313_s8, %s507_s19  ;;  %s592_s21 = smov [#allocation5]  }
  0x2f   : > { %s511_s15 = sshll.u32 %s592_s21, 4  ;;  %s512_s15 = int_to_ptr.vmem [resolvable:$false] %s511_s15 }
  0x30   : > { %p509_p11 = pnand %p508_p8, %p664_p9  ;;  %s513_s23 = scalar_lea.vmem %s512_s15, 512 }
  0x31   : > { %p514_p0 = scmp.lt.s32.totalorder %s313_s8, %s512_s15  ;;  %p515_p1 = scmp.lt.s32.totalorder %s513_s23, %s507_s19 }
  0x32   : > { %p510_p12 = pneg %p509_p11 }
  0x33   : > { %p516_p2 = por %p515_p1, %p514_p0 }
  0x35   : > { %p517_p3 = pnand %p516_p2, %p510_p12 }
  0xa8   : > { %v214_v6 = vpop.permute.xlu0 %213 }
  0xee   : > { %v286_v7 = vpop.f32.mrf.mxu0 }
  0xef   : > { %v287_v8 = vadd.f32 %v286_v7, %v214_v6 }
  0xf0   : > { %v288_v9 = vpop.f32.mrf.mxu0 }
  0xf1   : > { %v291_v10 = vadd.f32 %v287_v8, %v207_v3  ;;  %v289_v11 = vadd.f32 %v288_v9, %v214_v6 }
  0xf3   : > { %293 = vst [vmem:[%s204_s7] sm:$0xff] %v291_v10  ;;  %v292_v12 = vadd.f32 %v289_v11, %v208_v2 }
  0xf5   : > { %294 = vst [vmem:[%s204_s7 + $0x8] sm:$0xff] %v292_v12 }
  0xf6   : > { %520 = shalt.err (!%p517_p3)
}
  0xf7   : > { %s521_s28 = scalar_lea.hbm %s310_s11, 256  ;;  %s525_s30 = scalar_lea.hbm %s756_s3, 512 }
  0xf8   : > { %p522_p5 = scmp.ne.s32.totalorder %s310_s11, %s521_s28  ;;  %p526_p10 = scmp.lt.s32.totalorder %s310_s11, %s756_s3 }
  0xf9   : > { %p527_p4 = scmp.lt.s32.totalorder %s525_s30, %s521_s28 }
  0xfa   : > { %p523_p6 = pnand %p522_p5, %p664_p9 }
  0xfb   : > { %p528_p13 = por %p527_p4, %p526_p10 }
  0xfc   : > { %p524_p7 = pneg %p523_p6 }
  0xfe   : > { %p529_p8 = pnand %p528_p13, %p524_p7 }
 0x100   : > { %532 = shalt.err (!%p529_p8)
}
 0x101   : > { %416 = dma.vmem_to_hbm [thread:$0]  (%p664_p9), %s313_s8, 256, %s310_s11, %s296_s18  }
 0x102 PF: > { %s324_s6 = sand.u32 1, %s567_s12   ;;  %p762_p11 = scmp.ne.s32.totalorder %s760_s27, 0 }
 0x103   : > { %p763_p12 = scmp.ge.s32.totalorder %s587_s17, 2  ;;  %s325_s24 = scalar_lea.sflag [#allocation4], %s324_s6 }
 0x105   : > { %p423_p0 = pnand %p763_p12, %p762_p11 }
 0x107   : > { %p424_p1 = pneg %p423_p0 }
 0x109   : > { %562 = dma.done.wait (%p424_p1), %s325_s24, 256  }
 0x10a   : > { %564 = vsyncadd (%p424_p1), %s325_s24, 4294967040  ;;  %s19_s17 = sadd.s32 1, %s587_s17   ;;  %s764_s12 = smov %s571_s13 }
 0x10b   : > { %p16_p2 = scmp.ge.s32.totalorder %s19_s17, 4   ;;  %s765_s13 = smov %s575_s14 }
 0x10c   : > { %s766_s14 = smov %s669_s26  ;;  %s767_s15 = smov %s583_s16 }
 0x10d   : > { %s768_s16 = smov %s770_s20  ;;  %18 = sbr.rel (!%p16_p2) target bundleno = 6 (0x6), region = 77 }
 0x112   :  { %330 = vsyncpa [#allocation3], 1 }
 0x113   :  { %332 = vsyncpa [#allocation3 + $0x1], 1 }
 0x114   :  { %333 = vsyncpa [#allocation4], 1 }
 0x115   :  { %335 = vsyncpa [#allocation4 + $0x1], 1 }

</bundles_post_ra>
